<compile_context>
chip_gen: v5e
topology: v5e:2x2
jax: 0.10.0
libtpu: 0.0.40
codegen_flags: <defaults>
</compile_context>

<pallas_src>
import functools

import jax
import jax.numpy as jnp
from jax.experimental import pallas as pl
from jax.experimental.pallas import tpu as pltpu


def _classify_kernel(x_ref, w_ref, b_ref, o_ref):
    # x_ref: (TB, K) activations, w_ref: (K, NCP) folded weight,
    # b_ref: (1, NCP) f32 folded bias, o_ref: (TB, NCP).
    acc = jnp.dot(x_ref[...], w_ref[...],
                  preferred_element_type=jnp.float32)          # MXU, f32 acc
    o_ref[...] = (acc + b_ref[...]).astype(o_ref.dtype)        # full-lane store


def _round_up(x, m):
    return ((x + m - 1) // m) * m


@functools.partial(jax.jit, static_argnames=())
def classify_forward(x_nchw, w1, b1, w2, b2):
    """x_nchw: (N, C_in, H, W), w1: (C_in, 512), b1: (512,),
    w2: (512, num_classes), b2: (num_classes,)."""
    N, C_in, H, W = x_nchw.shape
    HW = H * W
    K = C_in * HW
    num_classes = w2.shape[1]
    NC_PAD = max(128, _round_up(num_classes, 128))   # lane-dense output slab

    # --- Constant fold (f32, independent of activation dtype) --------------
    w1f = w1.astype(jnp.float32)
    w2f = w2.astype(jnp.float32)
    w_fused = w1f @ w2f                                             # (C_in, NC)
    b_fused = b1.astype(jnp.float32) @ w2f + b2.astype(jnp.float32)  # (NC,)

    # Fold the spatial mean into the contraction: repeat each channel-row HW
    # times (matching the (c, hw) order of the flattened NCHW activations)
    # scaled by 1/HW.  Resulting weight: (C_in*HW, NC_PAD), ~K*128*4B in VMEM.
    w_exp = jnp.repeat(w_fused, HW, axis=0) * (1.0 / HW)            # (K, NC)
    w_exp = jnp.pad(w_exp, ((0, 0), (0, NC_PAD - num_classes)))
    w_exp = w_exp.astype(x_nchw.dtype)
    b_pad = jnp.pad(b_fused, (0, NC_PAD - num_classes)).reshape(1, NC_PAD)

    # Free reshape of contiguous NCHW -> (N, C_in*HW); no transpose, no copy.
    x = x_nchw.reshape(N, K)

    # --- Batch tiling -------------------------------------------------------
    # TB: sublane-aligned (multiple of 8), capped at 512 rows (flattened f32
    # block of TB*K*4B stays well inside every generation's scoped VMEM for
    # the shapes this module sees).  Small N => a single grid step (serial
    # grid on single-TC chips); large N => many "parallel" steps for megacore.
    TB = min(512, _round_up(N, 8))
    N_pad = _round_up(N, TB)
    if N_pad != N:
        x = jnp.pad(x, ((0, N_pad - N), (0, 0)))

    grid = (N_pad // TB,)

    bytes_accessed = (N_pad * K * x.dtype.itemsize
                      + K * NC_PAD * w_exp.dtype.itemsize
                      + NC_PAD * 4
                      + N_pad * NC_PAD * x.dtype.itemsize)
    cost = pl.CostEstimate(flops=2 * N_pad * K * NC_PAD,
                           transcendentals=0,
                           bytes_accessed=bytes_accessed)

    out = pl.pallas_call(
        _classify_kernel,
        out_shape=jax.ShapeDtypeStruct((N_pad, NC_PAD), x.dtype),
        grid_spec=pltpu.PrefetchScalarGridSpec(
            num_scalar_prefetch=0,
            grid=grid,
            in_specs=[
                pl.BlockSpec((TB, K), lambda b: (b, 0)),
                pl.BlockSpec((K, NC_PAD), lambda b: (0, 0)),
                pl.BlockSpec((1, NC_PAD), lambda b: (0, 0)),
            ],
            out_specs=pl.BlockSpec((TB, NC_PAD), lambda b: (b, 0)),
        ),
        compiler_params=pltpu.CompilerParams(
            dimension_semantics=("parallel",)),
        cost_estimate=cost,
    )(x, w_exp, b_pad)

    # Drop batch padding and the lane padding of the class dimension.
    out = out[:N, :num_classes]

    # Mirror x.squeeze(-1).squeeze(-1): only squeezes size-1 trailing dims.
    if out.shape[-1] == 1:
        out = out[..., 0]
        if out.ndim and out.shape[-1] == 1:
            out = out[..., 0]
    return out


def _reference(x_nchw, w1, b1, w2, b2):
    # Unfused reference: conv1x1 -> full-window avg pool -> linear.
    N, C_in, H, W = x_nchw.shape
    x = jnp.transpose(x_nchw, (0, 2, 3, 1)).reshape(N, H * W, C_in)
    h = jnp.einsum("npc,ch->nph", x, w1) + b1
    pooled = h.mean(axis=1)
    return pooled @ w2 + b2


if __name__ == "__main__":
    # Synthetic config (args.*): uni_dimension=32, hsi_windowSize=8, num_classes=16
    N, C_IN, H, W = 16, 32, 8, 8
    HIDDEN, NUM_CLASSES = 512, 16

    key = jax.random.PRNGKey(0)
    kx, kw1, kb1, kw2, kb2 = jax.random.split(key, 5)

    x = jax.random.normal(kx, (N, C_IN, H, W), dtype=jnp.float32)
    # Deterministic parameter init (synthetic, not a checkpoint load)
    w1 = jax.random.normal(kw1, (C_IN, HIDDEN), dtype=jnp.float32) * 0.05
    b1 = jax.random.normal(kb1, (HIDDEN,), dtype=jnp.float32) * 0.01
    w2 = jax.random.normal(kw2, (HIDDEN, NUM_CLASSES), dtype=jnp.float32) * 0.05
    b2 = jax.random.normal(kb2, (NUM_CLASSES,), dtype=jnp.float32) * 0.01

    out = classify_forward(x, w1, b1, w2, b2)
    out = jax.block_until_ready(out)

    ref = _reference(x, w1, b1, w2, b2)
    assert out.shape == (N, NUM_CLASSES), out.shape
    assert jnp.allclose(out, ref, atol=1e-4, rtol=1e-4), "mismatch vs reference"

    print("KERNEL_OK")
</pallas_src>

<mosaic_0001>
module attributes {stable_mosaic.version = 11 : i64} {
  func.func @_classify_kernel(%arg0: i32, %arg1: memref<16x2048xf32, #tpu.memory_space<vmem>>, %arg2: memref<2048x128xf32, #tpu.memory_space<vmem>>, %arg3: memref<1x128xf32, #tpu.memory_space<vmem>>, %arg4: memref<16x128xf32, #tpu.memory_space<vmem>>) attributes {dimension_semantics = [#tpu.dimension_semantics<parallel>], iteration_bounds = array<i64: 1>, scalar_prefetch = 0 : i64, scratch_operands = 0 : i64, tpu.core_type = #tpu.core_type<tc>, window_params = [{transform_indices = @transform_0, window_bounds = array<i64: 16, 2048>}, {pipeline_mode = #tpu.pipeline_mode<synchronous>, transform_indices = @transform_1, window_bounds = array<i64: 2048, 128>}, {pipeline_mode = #tpu.pipeline_mode<synchronous>, transform_indices = @transform_2, window_bounds = array<i64: 1, 128>}, {transform_indices = @transform_3, window_bounds = array<i64: 16, 128>}]} {
    %c0 = arith.constant 0 : index
    %c0_0 = arith.constant 0 : index
    %0 = vector.load %arg1[%c0, %c0_0] : memref<16x2048xf32, #tpu.memory_space<vmem>>, vector<16x2048xf32>
    %c0_1 = arith.constant 0 : index
    %c0_2 = arith.constant 0 : index
    %1 = vector.load %arg2[%c0_1, %c0_2] : memref<2048x128xf32, #tpu.memory_space<vmem>>, vector<2048x128xf32>
    %cst = arith.constant dense<0.000000e+00> : vector<16x128xf32>
    %2 = tpu.matmul %0, %1, %cst {dimension_numbers = #tpu.dot_dimension_numbers<[1], [0], [0], [1], [0, 0, 1, 1], [], []>} : vector<16x2048xf32>, vector<2048x128xf32>, vector<16x128xf32> -> vector<16x128xf32>
    %c0_3 = arith.constant 0 : index
    %c0_4 = arith.constant 0 : index
    %3 = vector.load %arg3[%c0_3, %c0_4] : memref<1x128xf32, #tpu.memory_space<vmem>>, vector<1x128xf32>
    %4 = vector.broadcast %3 : vector<1x128xf32> to vector<16x128xf32>
    %5 = arith.addf %2, %4 : vector<16x128xf32>
    %c0_5 = arith.constant 0 : index
    %c0_6 = arith.constant 0 : index
    %6 = vector.load %arg4[%c0_5, %c0_6] : memref<16x128xf32, #tpu.memory_space<vmem>>, vector<16x128xf32>
    tpu.vector_store %arg4[%c0_5, %c0_6], %5 {strides = array<i32>} : memref<16x128xf32, #tpu.memory_space<vmem>>, vector<16x128xf32>,
    return
  }
  func.func @transform_0(%arg0: i32) -> (i32, i32) {
    %c0_i32 = arith.constant 0 : i32
    %c0_i32_0 = arith.constant 0 : i32
    return %arg0, %c0_i32 : i32, i32
  }
  func.func @transform_1(%arg0: i32) -> (i32, i32) {
    %c0_i32 = arith.constant 0 : i32
    %c0_i32_0 = arith.constant 0 : i32
    %c0_i32_1 = arith.constant 0 : i32
    return %c0_i32, %c0_i32_0 : i32, i32
  }
  func.func @transform_2(%arg0: i32) -> (i32, i32) {
    %c0_i32 = arith.constant 0 : i32
    %c0_i32_0 = arith.constant 0 : i32
    %c0_i32_1 = arith.constant 0 : i32
    return %c0_i32, %c0_i32_0 : i32, i32
  }
  func.func @transform_3(%arg0: i32) -> (i32, i32) {
    %c0_i32 = arith.constant 0 : i32
    %c0_i32_0 = arith.constant 0 : i32
    return %arg0, %c0_i32 : i32, i32
  }
}

</mosaic_0001>

<bundles_post_ra>
// kernel: classify_forward.1
= control target key start
LH: loop header
LB: loop body
LE: loop exit
PB: predicated region body
PF: predicated region fallthrough
CT: control target
= control target key end

     0   :  { %s1618_s0 = inlined_call_operand.vmem [shape: f32[16,2048], index: 0, kind: input, shape index: {}]   ;;  %s1619_s1 = inlined_call_operand.vmem [shape: f32[2048,128], index: 1, kind: input, shape index: {}]   ;;  %s1620_s2 = inlined_call_operand.vmem [shape: f32[1,128], index: 2, kind: input, shape index: {}]   ;;  %s1621_s3 = inlined_call_operand.hbm [shape: f32[16,128], index: 3, kind: output, shape index: {}]  }
   0x1   :  { %v62_v0 = vld [vmem:[%s1619_s1 + $0x78] sm:$0xff]  ;;  %v61_v2 = vld [vmem:[%s1619_s1 + $0x70] sm:$0xff]  ;;  %v60_v6 = vld [vmem:[%s1619_s1 + $0x68] sm:$0xff] }
   0x2   :  { %v94_v1 = vld [vmem:[%s1619_s1 + $0x178] sm:$0xff]  ;;  %307 = vmatpush.msra.mxu0 %v62_v0  ;;  %v93_v4 = vld [vmem:[%s1619_s1 + $0x170] sm:$0xff]  ;;  %v92_v8 = vld [vmem:[%s1619_s1 + $0x168] sm:$0xff] }
   0x3   :  { %353 = vmatpush.msra.mxu2 %v94_v1  ;;  %v78_v3 = vld [vmem:[%s1619_s1 + $0xf8] sm:$0xff]  ;;  %v77_v7 = vld [vmem:[%s1619_s1 + $0xf0] sm:$0xff]  ;;  %v76_v10 = vld [vmem:[%s1619_s1 + $0xe8] sm:$0xff] }
   0x4   :  { %v110_v5 = vld [vmem:[%s1619_s1 + $0x1f8] sm:$0xff]  ;;  %330 = vmatpush.msra.mxu1 %v78_v3  ;;  %308 = vmatpush.msra.mxu0 %v61_v2  ;;  %v109_v9 = vld [vmem:[%s1619_s1 + $0x1f0] sm:$0xff]  ;;  %v59_v11 = vld [vmem:[%s1619_s1 + $0x60] sm:$0xff] }
   0x5   :  { %376 = vmatpush.msra.mxu3 %v110_v5  ;;  %354 = vmatpush.msra.mxu2 %v93_v4  ;;  %v91_v12 = vld [vmem:[%s1619_s1 + $0x160] sm:$0xff]  ;;  %v108_v13 = vld [vmem:[%s1619_s1 + $0x1e8] sm:$0xff]  ;;  %v58_v16 = vld [vmem:[%s1619_s1 + $0x58] sm:$0xff] }
   0x6   :  { %331 = vmatpush.msra.mxu1 %v77_v7  ;;  %309 = vmatpush.msra.mxu0 %v60_v6  ;;  %v75_v14 = vld [vmem:[%s1619_s1 + $0xe0] sm:$0xff]  ;;  %v90_v17 = vld [vmem:[%s1619_s1 + $0x158] sm:$0xff]  ;;  %v57_v20 = vld [vmem:[%s1619_s1 + $0x50] sm:$0xff] }
   0x7   :  { %377 = vmatpush.msra.mxu3 %v109_v9  ;;  %355 = vmatpush.msra.mxu2 %v92_v8  ;;  %v107_v15 = vld [vmem:[%s1619_s1 + $0x1e0] sm:$0xff]  ;;  %v74_v18 = vld [vmem:[%s1619_s1 + $0xd8] sm:$0xff]  ;;  %v89_v21 = vld [vmem:[%s1619_s1 + $0x150] sm:$0xff] }
   0x8   :  { %332 = vmatpush.msra.mxu1 %v76_v10  ;;  %310 = vmatpush.msra.mxu0 %v59_v11  ;;  %v106_v19 = vld [vmem:[%s1619_s1 + $0x1d8] sm:$0xff]  ;;  %v73_v22 = vld [vmem:[%s1619_s1 + $0xd0] sm:$0xff]  ;;  %v56_v24 = vld [vmem:[%s1619_s1 + $0x48] sm:$0xff] }
   0x9   :  { %378 = vmatpush.msra.mxu3 %v108_v13  ;;  %356 = vmatpush.msra.mxu2 %v91_v12  ;;  %v105_v23 = vld [vmem:[%s1619_s1 + $0x1d0] sm:$0xff]  ;;  %v88_v25 = vld [vmem:[%s1619_s1 + $0x148] sm:$0xff]  ;;  %v55_v28 = vld [vmem:[%s1619_s1 + $0x40] sm:$0xff] }
   0xa   :  { %333 = vmatpush.msra.mxu1 %v75_v14  ;;  %311 = vmatpush.msra.mxu0 %v58_v16  ;;  %v72_v26 = vld [vmem:[%s1619_s1 + $0xc8] sm:$0xff]  ;;  %v87_v29 = vld [vmem:[%s1619_s1 + $0x140] sm:$0xff]  ;;  %v54_v32 = vld [vmem:[%s1619_s1 + $0x38] sm:$0xff] }
   0xb   :  { %379 = vmatpush.msra.mxu3 %v107_v15  ;;  %357 = vmatpush.msra.mxu2 %v90_v17  ;;  %v104_v27 = vld [vmem:[%s1619_s1 + $0x1c8] sm:$0xff]  ;;  %v71_v30 = vld [vmem:[%s1619_s1 + $0xc0] sm:$0xff]  ;;  %v86_v33 = vld [vmem:[%s1619_s1 + $0x138] sm:$0xff] }
   0xc   :  { %334 = vmatpush.msra.mxu1 %v74_v18  ;;  %312 = vmatpush.msra.mxu0 %v57_v20  ;;  %v103_v31 = vld [vmem:[%s1619_s1 + $0x1c0] sm:$0xff]  ;;  %v70_v34 = vld [vmem:[%s1619_s1 + $0xb8] sm:$0xff]  ;;  %v53_v36 = vld [vmem:[%s1619_s1 + $0x30] sm:$0xff] }
   0xd   :  { %380 = vmatpush.msra.mxu3 %v106_v19  ;;  %358 = vmatpush.msra.mxu2 %v89_v21  ;;  %v102_v35 = vld [vmem:[%s1619_s1 + $0x1b8] sm:$0xff]  ;;  %v85_v37 = vld [vmem:[%s1619_s1 + $0x130] sm:$0xff]  ;;  %v52_v40 = vld [vmem:[%s1619_s1 + $0x28] sm:$0xff] }
   0xe   :  { %335 = vmatpush.msra.mxu1 %v73_v22  ;;  %313 = vmatpush.msra.mxu0 %v56_v24  ;;  %v69_v38 = vld [vmem:[%s1619_s1 + $0xb0] sm:$0xff]  ;;  %v84_v41 = vld [vmem:[%s1619_s1 + $0x128] sm:$0xff]  ;;  %v51_v44 = vld [vmem:[%s1619_s1 + $0x20] sm:$0xff] }
   0xf   :  { %381 = vmatpush.msra.mxu3 %v105_v23  ;;  %359 = vmatpush.msra.mxu2 %v88_v25  ;;  %v101_v39 = vld [vmem:[%s1619_s1 + $0x1b0] sm:$0xff]  ;;  %v68_v42 = vld [vmem:[%s1619_s1 + $0xa8] sm:$0xff]  ;;  %v83_v45 = vld [vmem:[%s1619_s1 + $0x120] sm:$0xff] }
  0x10   :  { %336 = vmatpush.msra.mxu1 %v72_v26  ;;  %314 = vmatpush.msra.mxu0 %v55_v28  ;;  %v100_v43 = vld [vmem:[%s1619_s1 + $0x1a8] sm:$0xff]  ;;  %v67_v46 = vld [vmem:[%s1619_s1 + $0xa0] sm:$0xff]  ;;  %v50_v48 = vld [vmem:[%s1619_s1 + $0x18] sm:$0xff] }
  0x11   :  { %382 = vmatpush.msra.mxu3 %v104_v27  ;;  %360 = vmatpush.msra.mxu2 %v87_v29  ;;  %v99_v47 = vld [vmem:[%s1619_s1 + $0x1a0] sm:$0xff]  ;;  %v82_v49 = vld [vmem:[%s1619_s1 + $0x118] sm:$0xff]  ;;  %v49_v52 = vld [vmem:[%s1619_s1 + $0x10] sm:$0xff] }
  0x12   :  { %337 = vmatpush.msra.mxu1 %v71_v30  ;;  %315 = vmatpush.msra.mxu0 %v54_v32  ;;  %v66_v50 = vld [vmem:[%s1619_s1 + $0x98] sm:$0xff]  ;;  %v81_v53 = vld [vmem:[%s1619_s1 + $0x110] sm:$0xff]  ;;  %v48_v56 = vld [vmem:[%s1619_s1 + $0x8] sm:$0xff] }
  0x13   :  { %383 = vmatpush.msra.mxu3 %v103_v31  ;;  %361 = vmatpush.msra.mxu2 %v86_v33  ;;  %v98_v51 = vld [vmem:[%s1619_s1 + $0x198] sm:$0xff]  ;;  %v65_v54 = vld [vmem:[%s1619_s1 + $0x90] sm:$0xff]  ;;  %v80_v57 = vld [vmem:[%s1619_s1 + $0x108] sm:$0xff] }
  0x14   :  { %338 = vmatpush.msra.mxu1 %v70_v34  ;;  %316 = vmatpush.msra.mxu0 %v53_v36  ;;  %v97_v55 = vld [vmem:[%s1619_s1 + $0x190] sm:$0xff]  ;;  %v64_v58 = vld [vmem:[%s1619_s1 + $0x88] sm:$0xff]  ;;  %v47_v60 = vld [vmem:[%s1619_s1] sm:$0xff] }
  0x15   :  { %384 = vmatpush.msra.mxu3 %v102_v35  ;;  %362 = vmatpush.msra.mxu2 %v85_v37  ;;  %v96_v59 = vld [vmem:[%s1619_s1 + $0x188] sm:$0xff]  ;;  %v79_v61 = vld [vmem:[%s1619_s1 + $0x100] sm:$0xff]  ;;  %v126_v62 = vld [vmem:[%s1619_s1 + $0x278] sm:$0xff] }
  0x16   :  { %339 = vmatpush.msra.mxu1 %v69_v38  ;;  %317 = vmatpush.msra.mxu0 %v52_v40  ;;  %v158_v63 = vld [vmem:[%s1619_s1 + $0x378] sm:$0xff]  ;;  %v63_v0 = vld [vmem:[%s1619_s1 + $0x80] sm:$0xff]  ;;  %v125_v2 = vld [vmem:[%s1619_s1 + $0x270] sm:$0xff] }
  0x17   :  { %385 = vmatpush.msra.mxu3 %v101_v39  ;;  %363 = vmatpush.msra.mxu2 %v84_v41  ;;  %v95_v1 = vld [vmem:[%s1619_s1 + $0x180] sm:$0xff]  ;;  %v142_v3 = vld [vmem:[%s1619_s1 + $0x2f8] sm:$0xff]  ;;  %v157_v4 = vld [vmem:[%s1619_s1 + $0x370] sm:$0xff] }
  0x18   :  { %340 = vmatpush.msra.mxu1 %v68_v42  ;;  %318 = vmatpush.msra.mxu0 %v51_v44  ;;  %v174_v5 = vld [vmem:[%s1619_s1 + $0x3f8] sm:$0xff]  ;;  %v124_v6 = vld [vmem:[%s1619_s1 + $0x268] sm:$0xff]  ;;  %v141_v7 = vld [vmem:[%s1619_s1 + $0x2f0] sm:$0xff] }
  0x19   :  { %386 = vmatpush.msra.mxu3 %v100_v43  ;;  %364 = vmatpush.msra.mxu2 %v83_v45  ;;  %v156_v8 = vld [vmem:[%s1619_s1 + $0x368] sm:$0xff]  ;;  %v173_v9 = vld [vmem:[%s1619_s1 + $0x3f0] sm:$0xff]  ;;  %v123_v10 = vld [vmem:[%s1619_s1 + $0x260] sm:$0xff] }
  0x1a   :  { %341 = vmatpush.msra.mxu1 %v67_v46  ;;  %319 = vmatpush.msra.mxu0 %v50_v48  ;;  %v140_v11 = vld [vmem:[%s1619_s1 + $0x2e8] sm:$0xff]  ;;  %v155_v12 = vld [vmem:[%s1619_s1 + $0x360] sm:$0xff]  ;;  %v122_v14 = vld [vmem:[%s1619_s1 + $0x258] sm:$0xff] }
  0x1b   :  { %387 = vmatpush.msra.mxu3 %v99_v47  ;;  %365 = vmatpush.msra.mxu2 %v82_v49  ;;  %v172_v13 = vld [vmem:[%s1619_s1 + $0x3e8] sm:$0xff]  ;;  %v139_v15 = vld [vmem:[%s1619_s1 + $0x2e0] sm:$0xff]  ;;  %v154_v16 = vld [vmem:[%s1619_s1 + $0x358] sm:$0xff] }
  0x1c   :  { %342 = vmatpush.msra.mxu1 %v66_v50  ;;  %320 = vmatpush.msra.mxu0 %v49_v52  ;;  %v171_v17 = vld [vmem:[%s1619_s1 + $0x3e0] sm:$0xff]  ;;  %v121_v18 = vld [vmem:[%s1619_s1 + $0x250] sm:$0xff]  ;;  %v138_v19 = vld [vmem:[%s1619_s1 + $0x2d8] sm:$0xff] }
  0x1d   :  { %388 = vmatpush.msra.mxu3 %v98_v51  ;;  %366 = vmatpush.msra.mxu2 %v81_v53  ;;  %v153_v20 = vld [vmem:[%s1619_s1 + $0x350] sm:$0xff]  ;;  %v170_v21 = vld [vmem:[%s1619_s1 + $0x3d8] sm:$0xff]  ;;  %v120_v22 = vld [vmem:[%s1619_s1 + $0x248] sm:$0xff] }
  0x1e   :  { %343 = vmatpush.msra.mxu1 %v65_v54  ;;  %321 = vmatpush.msra.mxu0 %v48_v56  ;;  %v137_v23 = vld [vmem:[%s1619_s1 + $0x2d0] sm:$0xff]  ;;  %v152_v24 = vld [vmem:[%s1619_s1 + $0x348] sm:$0xff]  ;;  %v119_v26 = vld [vmem:[%s1619_s1 + $0x240] sm:$0xff] }
  0x1f   :  { %389 = vmatpush.msra.mxu3 %v97_v55  ;;  %367 = vmatpush.msra.mxu2 %v80_v57  ;;  %v169_v25 = vld [vmem:[%s1619_s1 + $0x3d0] sm:$0xff]  ;;  %v136_v27 = vld [vmem:[%s1619_s1 + $0x2c8] sm:$0xff]  ;;  %v151_v28 = vld [vmem:[%s1619_s1 + $0x340] sm:$0xff] }
  0x20   :  { %344 = vmatpush.msra.mxu1 %v64_v58  ;;  %322 = vmatpush.msra.mxu0 %v47_v60  ;;  %v168_v29 = vld [vmem:[%s1619_s1 + $0x3c8] sm:$0xff]  ;;  %v118_v30 = vld [vmem:[%s1619_s1 + $0x238] sm:$0xff]  ;;  %v135_v31 = vld [vmem:[%s1619_s1 + $0x2c0] sm:$0xff] }
  0x21   :  { %390 = vmatpush.msra.mxu3 %v96_v59  ;;  %368 = vmatpush.msra.mxu2 %v79_v61  ;;  %v150_v32 = vld [vmem:[%s1619_s1 + $0x338] sm:$0xff]  ;;  %v167_v33 = vld [vmem:[%s1619_s1 + $0x3c0] sm:$0xff]  ;;  %v117_v34 = vld [vmem:[%s1619_s1 + $0x230] sm:$0xff] }
  0x22   :  { %399 = vmatpush.msrb.mxu0 %v126_v62  ;;  %345 = vmatpush.msra.mxu1 %v63_v0  ;;  %v134_v35 = vld [vmem:[%s1619_s1 + $0x2b8] sm:$0xff]  ;;  %v149_v36 = vld [vmem:[%s1619_s1 + $0x330] sm:$0xff]  ;;  %v116_v38 = vld [vmem:[%s1619_s1 + $0x228] sm:$0xff] }
  0x23   :  { %445 = vmatpush.msrb.mxu2 %v158_v63  ;;  %391 = vmatpush.msra.mxu3 %v95_v1  ;;  %v166_v37 = vld [vmem:[%s1619_s1 + $0x3b8] sm:$0xff]  ;;  %v133_v39 = vld [vmem:[%s1619_s1 + $0x2b0] sm:$0xff]  ;;  %v148_v40 = vld [vmem:[%s1619_s1 + $0x328] sm:$0xff] }
  0x24   :  { %400 = vmatpush.msrb.mxu0 %v125_v2  ;;  %422 = vmatpush.msrb.mxu1 %v142_v3  ;;  %v165_v41 = vld [vmem:[%s1619_s1 + $0x3b0] sm:$0xff]  ;;  %v115_v42 = vld [vmem:[%s1619_s1 + $0x220] sm:$0xff]  ;;  %v132_v43 = vld [vmem:[%s1619_s1 + $0x2a8] sm:$0xff] }
  0x25   :  { %446 = vmatpush.msrb.mxu2 %v157_v4  ;;  %468 = vmatpush.msrb.mxu3 %v174_v5  ;;  %v147_v44 = vld [vmem:[%s1619_s1 + $0x320] sm:$0xff]  ;;  %v164_v45 = vld [vmem:[%s1619_s1 + $0x3a8] sm:$0xff]  ;;  %v17_v46 = vld [vmem:[%s1618_s0 + $0x10] sm:$0xff] }
  0x26   :  { %401 = vmatpush.msrb.mxu0 %v124_v6  ;;  %423 = vmatpush.msrb.mxu1 %v141_v7  ;;  %v114_v47 = vld [vmem:[%s1619_s1 + $0x218] sm:$0xff]  ;;  %v131_v48 = vld [vmem:[%s1619_s1 + $0x2a0] sm:$0xff]  ;;  %v113_v53 = vld [vmem:[%s1619_s1 + $0x210] sm:$0xff] }
  0x27   :  { %447 = vmatpush.msrb.mxu2 %v156_v8  ;;  %469 = vmatpush.msrb.mxu3 %v173_v9  ;;  %v146_v49 = vld [vmem:[%s1619_s1 + $0x318] sm:$0xff]  ;;  %v163_v50 = vld [vmem:[%s1619_s1 + $0x3a0] sm:$0xff]  ;;  %v145_v55 = vld [vmem:[%s1619_s1 + $0x310] sm:$0xff] }
  0x28   :  { %402 = vmatpush.msrb.mxu0 %v123_v10  ;;  %424 = vmatpush.msrb.mxu1 %v140_v11  ;;  %v15_v51 = vld [vmem:[%s1618_s0] sm:$0xff]  ;;  %v18_v52 = vld [vmem:[%s1618_s0 + $0x18] sm:$0xff]  ;;  %v16_v57 = vld [vmem:[%s1618_s0 + $0x8] sm:$0xff] }
  0x29   :  { %448 = vmatpush.msrb.mxu2 %v155_v12  ;;  %470 = vmatpush.msrb.mxu3 %v172_v13  ;;  %v130_v54 = vld [vmem:[%s1619_s1 + $0x298] sm:$0xff]  ;;  %v112_v58 = vld [vmem:[%s1619_s1 + $0x208] sm:$0xff]  ;;  %v129_v59 = vld [vmem:[%s1619_s1 + $0x290] sm:$0xff] }
  0x2a   :  { %403 = vmatpush.msrb.mxu0 %v122_v14  ;;  %425 = vmatpush.msrb.mxu1 %v139_v15  ;;  %v162_v56 = vld [vmem:[%s1619_s1 + $0x398] sm:$0xff]  ;;  %v144_v60 = vld [vmem:[%s1619_s1 + $0x308] sm:$0xff]  ;;  %v161_v61 = vld [vmem:[%s1619_s1 + $0x390] sm:$0xff] }
  0x2b   :  { %449 = vmatpush.msrb.mxu2 %v154_v16  ;;  %471 = vmatpush.msrb.mxu3 %v171_v17  ;;  %v111_v62 = vld [vmem:[%s1619_s1 + $0x200] sm:$0xff]  ;;  %v128_v63 = vld [vmem:[%s1619_s1 + $0x288] sm:$0xff]  ;;  %v33_v2 = vld [vmem:[%s1618_s0 + $0x90] sm:$0xff] }
  0x2c   :  { %404 = vmatpush.msrb.mxu0 %v121_v18  ;;  %426 = vmatpush.msrb.mxu1 %v138_v19  ;;  %v143_v0 = vld [vmem:[%s1619_s1 + $0x300] sm:$0xff]  ;;  %v160_v1 = vld [vmem:[%s1619_s1 + $0x388] sm:$0xff]  ;;  %v190_v3 = vld [vmem:[%s1619_s1 + $0x478] sm:$0xff] }
  0x2d   :  { %450 = vmatpush.msrb.mxu2 %v153_v20  ;;  %472 = vmatpush.msrb.mxu3 %v170_v21  ;;  %v222_v4 = vld [vmem:[%s1619_s1 + $0x578] sm:$0xff]  ;;  %v127_v5 = vld [vmem:[%s1619_s1 + $0x280] sm:$0xff]  ;;  %v189_v9 = vld [vmem:[%s1619_s1 + $0x470] sm:$0xff] }
  0x2e   :  { %405 = vmatpush.msrb.mxu0 %v120_v22  ;;  %427 = vmatpush.msrb.mxu1 %v137_v23  ;;  %v159_v6 = vld [vmem:[%s1619_s1 + $0x380] sm:$0xff]  ;;  %v34_v8 = vld [vmem:[%s1618_s0 + $0x98] sm:$0xff] }
  0x2f   :  { %451 = vmatpush.msrb.mxu2 %v152_v24  ;;  %473 = vmatpush.msrb.mxu3 %v169_v25  ;;  %v31_v7 = vld [vmem:[%s1618_s0 + $0x80] sm:$0xff] }
  0x30   :  { %406 = vmatpush.msrb.mxu0 %v119_v26  ;;  %428 = vmatpush.msrb.mxu1 %v136_v27 }
  0x31   :  { %452 = vmatpush.msrb.mxu2 %v151_v28  ;;  %474 = vmatpush.msrb.mxu3 %v168_v29 }
  0x32   :  { %407 = vmatpush.msrb.mxu0 %v118_v30  ;;  %429 = vmatpush.msrb.mxu1 %v135_v31 }
  0x33   :  { %453 = vmatpush.msrb.mxu2 %v150_v32  ;;  %475 = vmatpush.msrb.mxu3 %v167_v33 }
  0x34   :  { %408 = vmatpush.msrb.mxu0 %v117_v34  ;;  %430 = vmatpush.msrb.mxu1 %v134_v35 }
  0x35   :  { %454 = vmatpush.msrb.mxu2 %v149_v36  ;;  %476 = vmatpush.msrb.mxu3 %v166_v37 }
  0x36   :  { %409 = vmatpush.msrb.mxu0 %v116_v38  ;;  %431 = vmatpush.msrb.mxu1 %v133_v39 }
  0x37   :  { %455 = vmatpush.msrb.mxu2 %v148_v40  ;;  %477 = vmatpush.msrb.mxu3 %v165_v41 }
  0x38   :  { %410 = vmatpush.msrb.mxu0 %v115_v42  ;;  %432 = vmatpush.msrb.mxu1 %v132_v43 }
  0x39   :  { %456 = vmatpush.msrb.mxu2 %v147_v44  ;;  %478 = vmatpush.msrb.mxu3 %v164_v45 }
  0x3a   :  { %369 = vmatmul.f32.vlgmr.msra.gmra.mxu2 %v17_v46  ;;  %411 = vmatpush.msrb.mxu0 %v114_v47 }
  0x3b   :  { %433 = vmatpush.msrb.mxu1 %v131_v48  ;;  %457 = vmatpush.msrb.mxu2 %v146_v49 }
  0x3c   :  { %479 = vmatpush.msrb.mxu3 %v163_v50  ;;  %323 = vmatmul.f32.vlgmr.msra.gmra.mxu0 %v15_v51 }
  0x3d   :  { %392 = vmatmul.f32.vlgmr.msra.gmra.mxu3 %v18_v52  ;;  %412 = vmatpush.msrb.mxu0 %v113_v53 }
  0x3e   :  { %434 = vmatpush.msrb.mxu1 %v130_v54  ;;  %458 = vmatpush.msrb.mxu2 %v145_v55 }
  0x3f   :  { %480 = vmatpush.msrb.mxu3 %v162_v56  ;;  %346 = vmatmul.f32.vlgmr.msra.gmra.mxu1 %v16_v57 }
  0x40   :  { %413 = vmatpush.msrb.mxu0 %v112_v58  ;;  %435 = vmatpush.msrb.mxu1 %v129_v59 }
  0x41   :  { %459 = vmatpush.msrb.mxu2 %v144_v60  ;;  %481 = vmatpush.msrb.mxu3 %v161_v61 }
  0x42   :  { %414 = vmatpush.msrb.mxu0 %v111_v62  ;;  %436 = vmatpush.msrb.mxu1 %v128_v63 }
  0x43   :  { %460 = vmatpush.msrb.mxu2 %v143_v0  ;;  %482 = vmatpush.msrb.mxu3 %v160_v1 }
  0x44   :  { %372 = vmatmul.f32.gmra.mxu2 %v33_v2  ;;  %491 = vmatpush.msra.mxu0 %v190_v3 }
  0x45   :  { %8 = vsyncpa [#allocation3], 0  ;;  %537 = vmatpush.msra.mxu2 %v222_v4  ;;  %437 = vmatpush.msrb.mxu1 %v127_v5  ;;  %v206_v10 = vld [vmem:[%s1619_s1 + $0x4f8] sm:$0xff]  ;;  %v221_v11 = vld [vmem:[%s1619_s1 + $0x570] sm:$0xff]  ;;  %s683_s24 = sshll.u32 %s1621_s3, 4  ;;  %s726_s25 = smov 128   ;;  %s684_s24 = int_to_ptr.hbm [resolvable:$true] %s683_s24 }
  0x46   :  { %483 = vmatpush.msrb.mxu3 %v159_v6  ;;  %326 = vmatmul.f32.gmra.mxu0 %v31_v7  ;;  %v238_v12 = vld [vmem:[%s1619_s1 + $0x5f8] sm:$0xff]  ;;  %v32_v13 = vld [vmem:[%s1618_s0 + $0x88] sm:$0xff]  ;;  %v205_v15 = vld [vmem:[%s1619_s1 + $0x4f0] sm:$0xff]  ;;  %s727_s26 = smov 8  }
  0x47   :  { %395 = vmatmul.f32.gmra.mxu3 %v34_v8  ;;  %492 = vmatpush.msra.mxu0 %v189_v9  ;;  %v188_v14 = vld [vmem:[%s1619_s1 + $0x468] sm:$0xff]  ;;  %v237_v17 = vld [vmem:[%s1619_s1 + $0x5f0] sm:$0xff]  ;;  %v187_v18 = vld [vmem:[%s1619_s1 + $0x460] sm:$0xff] }
  0x48   :  { %514 = vmatpush.msra.mxu1 %v206_v10  ;;  %538 = vmatpush.msra.mxu2 %v221_v11  ;;  %v220_v16 = vld [vmem:[%s1619_s1 + $0x568] sm:$0xff]  ;;  %v219_v20 = vld [vmem:[%s1619_s1 + $0x560] sm:$0xff]  ;;  %v21_v22 = vld [vmem:[%s1618_s0 + $0x30] sm:$0xff] }
  0x49   :  { %560 = vmatpush.msra.mxu3 %v238_v12  ;;  %349 = vmatmul.f32.gmra.mxu1 %v32_v13  ;;  %v204_v19 = vld [vmem:[%s1619_s1 + $0x4e8] sm:$0xff]  ;;  %v186_v23 = vld [vmem:[%s1619_s1 + $0x458] sm:$0xff]  ;;  %v203_v24 = vld [vmem:[%s1619_s1 + $0x4e0] sm:$0xff] }
  0x4a   :  { %493 = vmatpush.msra.mxu0 %v188_v14  ;;  %515 = vmatpush.msra.mxu1 %v205_v15  ;;  %v236_v21 = vld [vmem:[%s1619_s1 + $0x5e8] sm:$0xff]  ;;  %v218_v25 = vld [vmem:[%s1619_s1 + $0x558] sm:$0xff]  ;;  %v235_v26 = vld [vmem:[%s1619_s1 + $0x5e0] sm:$0xff] }
  0x4b   :  { %539 = vmatpush.msra.mxu2 %v220_v16  ;;  %561 = vmatpush.msra.mxu3 %v237_v17  ;;  %v19_v27 = vld [vmem:[%s1618_s0 + $0x20] sm:$0xff]  ;;  %v22_v28 = vld [vmem:[%s1618_s0 + $0x38] sm:$0xff]  ;;  %v185_v29 = vld [vmem:[%s1619_s1 + $0x450] sm:$0xff] }
  0x4c   :  { %494 = vmatpush.msra.mxu0 %v187_v18  ;;  %516 = vmatpush.msra.mxu1 %v204_v19  ;;  %v202_v30 = vld [vmem:[%s1619_s1 + $0x4d8] sm:$0xff]  ;;  %v217_v31 = vld [vmem:[%s1619_s1 + $0x550] sm:$0xff]  ;;  %v20_v33 = vld [vmem:[%s1618_s0 + $0x28] sm:$0xff] }
  0x4d   :  { %540 = vmatpush.msra.mxu2 %v219_v20  ;;  %562 = vmatpush.msra.mxu3 %v236_v21  ;;  %v234_v32 = vld [vmem:[%s1619_s1 + $0x5d8] sm:$0xff]  ;;  %v184_v34 = vld [vmem:[%s1619_s1 + $0x448] sm:$0xff]  ;;  %v201_v35 = vld [vmem:[%s1619_s1 + $0x4d0] sm:$0xff] }
  0x4e   :  { %461 = vmatmul.f32.vlgmr.msrb.gmra.mxu2 %v21_v22  ;;  %495 = vmatpush.msra.mxu0 %v186_v23  ;;  %v216_v36 = vld [vmem:[%s1619_s1 + $0x548] sm:$0xff]  ;;  %v233_v37 = vld [vmem:[%s1619_s1 + $0x5d0] sm:$0xff]  ;;  %v183_v38 = vld [vmem:[%s1619_s1 + $0x440] sm:$0xff] }
  0x4f   :  { %517 = vmatpush.msra.mxu1 %v203_v24  ;;  %541 = vmatpush.msra.mxu2 %v218_v25  ;;  %v200_v39 = vld [vmem:[%s1619_s1 + $0x4c8] sm:$0xff]  ;;  %v215_v40 = vld [vmem:[%s1619_s1 + $0x540] sm:$0xff]  ;;  %v182_v42 = vld [vmem:[%s1619_s1 + $0x438] sm:$0xff] }
  0x50   :  { %563 = vmatpush.msra.mxu3 %v235_v26  ;;  %415 = vmatmul.f32.vlgmr.msrb.gmra.mxu0 %v19_v27  ;;  %v232_v41 = vld [vmem:[%s1619_s1 + $0x5c8] sm:$0xff]  ;;  %v199_v43 = vld [vmem:[%s1619_s1 + $0x4c0] sm:$0xff]  ;;  %v214_v44 = vld [vmem:[%s1619_s1 + $0x538] sm:$0xff] }
  0x51   :  { %484 = vmatmul.f32.vlgmr.msrb.gmra.mxu3 %v22_v28  ;;  %496 = vmatpush.msra.mxu0 %v185_v29  ;;  %v231_v45 = vld [vmem:[%s1619_s1 + $0x5c0] sm:$0xff]  ;;  %v181_v46 = vld [vmem:[%s1619_s1 + $0x430] sm:$0xff]  ;;  %v198_v47 = vld [vmem:[%s1619_s1 + $0x4b8] sm:$0xff] }
  0x52   :  { %518 = vmatpush.msra.mxu1 %v202_v30  ;;  %542 = vmatpush.msra.mxu2 %v217_v31  ;;  %v213_v48 = vld [vmem:[%s1619_s1 + $0x530] sm:$0xff]  ;;  %v230_v49 = vld [vmem:[%s1619_s1 + $0x5b8] sm:$0xff]  ;;  %v180_v50 = vld [vmem:[%s1619_s1 + $0x428] sm:$0xff] }
  0x53   :  { %564 = vmatpush.msra.mxu3 %v234_v32  ;;  %438 = vmatmul.f32.vlgmr.msrb.gmra.mxu1 %v20_v33  ;;  %v197_v51 = vld [vmem:[%s1619_s1 + $0x4b0] sm:$0xff]  ;;  %v212_v52 = vld [vmem:[%s1619_s1 + $0x528] sm:$0xff]  ;;  %v179_v54 = vld [vmem:[%s1619_s1 + $0x420] sm:$0xff] }
  0x54   :  { %497 = vmatpush.msra.mxu0 %v184_v34  ;;  %519 = vmatpush.msra.mxu1 %v201_v35  ;;  %v229_v53 = vld [vmem:[%s1619_s1 + $0x5b0] sm:$0xff]  ;;  %v196_v55 = vld [vmem:[%s1619_s1 + $0x4a8] sm:$0xff]  ;;  %v211_v56 = vld [vmem:[%s1619_s1 + $0x520] sm:$0xff] }
  0x55   :  { %543 = vmatpush.msra.mxu2 %v216_v36  ;;  %565 = vmatpush.msra.mxu3 %v233_v37  ;;  %v228_v57 = vld [vmem:[%s1619_s1 + $0x5a8] sm:$0xff]  ;;  %v35_v58 = vld [vmem:[%s1618_s0 + $0xa0] sm:$0xff]  ;;  %v37_v59 = vld [vmem:[%s1618_s0 + $0xb0] sm:$0xff] }
  0x56   :  { %498 = vmatpush.msra.mxu0 %v183_v38  ;;  %520 = vmatpush.msra.mxu1 %v200_v39  ;;  %v178_v60 = vld [vmem:[%s1619_s1 + $0x418] sm:$0xff]  ;;  %v195_v61 = vld [vmem:[%s1619_s1 + $0x4a0] sm:$0xff]  ;;  %v36_v0 = vld [vmem:[%s1618_s0 + $0xa8] sm:$0xff] }
  0x57   :  { %544 = vmatpush.msra.mxu2 %v215_v40  ;;  %566 = vmatpush.msra.mxu3 %v232_v41  ;;  %v210_v62 = vld [vmem:[%s1619_s1 + $0x518] sm:$0xff]  ;;  %v227_v63 = vld [vmem:[%s1619_s1 + $0x5a0] sm:$0xff]  ;;  %v177_v2 = vld [vmem:[%s1619_s1 + $0x410] sm:$0xff] }
  0x58   :  { %499 = vmatpush.msra.mxu0 %v182_v42  ;;  %521 = vmatpush.msra.mxu1 %v199_v43  ;;  %v38_v1 = vld [vmem:[%s1618_s0 + $0xb8] sm:$0xff]  ;;  %v209_v4 = vld [vmem:[%s1619_s1 + $0x510] sm:$0xff]  ;;  %v176_v6 = vld [vmem:[%s1619_s1 + $0x408] sm:$0xff] }
  0x59   :  { %545 = vmatpush.msra.mxu2 %v214_v44  ;;  %567 = vmatpush.msra.mxu3 %v231_v45  ;;  %v194_v3 = vld [vmem:[%s1619_s1 + $0x498] sm:$0xff]  ;;  %v193_v7 = vld [vmem:[%s1619_s1 + $0x490] sm:$0xff]  ;;  %v208_v8 = vld [vmem:[%s1619_s1 + $0x508] sm:$0xff] }
  0x5a   :  { %500 = vmatpush.msra.mxu0 %v181_v46  ;;  %522 = vmatpush.msra.mxu1 %v198_v47  ;;  %v226_v5 = vld [vmem:[%s1619_s1 + $0x598] sm:$0xff]  ;;  %v225_v9 = vld [vmem:[%s1619_s1 + $0x590] sm:$0xff]  ;;  %v175_v10 = vld [vmem:[%s1619_s1 + $0x400] sm:$0xff] }
  0x5b   :  { %546 = vmatpush.msra.mxu2 %v213_v48  ;;  %568 = vmatpush.msra.mxu3 %v230_v49  ;;  %v192_v11 = vld [vmem:[%s1619_s1 + $0x488] sm:$0xff]  ;;  %v207_v12 = vld [vmem:[%s1619_s1 + $0x500] sm:$0xff]  ;;  %v25_v15 = vld [vmem:[%s1618_s0 + $0x50] sm:$0xff] }
  0x5c   :  { %501 = vmatpush.msra.mxu0 %v180_v50  ;;  %523 = vmatpush.msra.mxu1 %v197_v51  ;;  %v224_v13 = vld [vmem:[%s1619_s1 + $0x588] sm:$0xff]  ;;  %v23_v14 = vld [vmem:[%s1618_s0 + $0x40] sm:$0xff]  ;;  %v254_v16 = vld [vmem:[%s1619_s1 + $0x678] sm:$0xff] }
  0x5d   :  { %547 = vmatpush.msra.mxu2 %v212_v52  ;;  %569 = vmatpush.msra.mxu3 %v229_v53  ;;  %v286_v17 = vld [vmem:[%s1619_s1 + $0x778] sm:$0xff]  ;;  %v191_v18 = vld [vmem:[%s1619_s1 + $0x480] sm:$0xff]  ;;  %v24_v20 = vld [vmem:[%s1618_s0 + $0x48] sm:$0xff] }
  0x5e   :  { %502 = vmatpush.msra.mxu0 %v179_v54  ;;  %524 = vmatpush.msra.mxu1 %v196_v55  ;;  %v223_v19 = vld [vmem:[%s1619_s1 + $0x580] sm:$0xff]  ;;  %v26_v21 = vld [vmem:[%s1618_s0 + $0x58] sm:$0xff]  ;;  %v253_v22 = vld [vmem:[%s1619_s1 + $0x670] sm:$0xff] }
  0x5f   :  { %548 = vmatpush.msra.mxu2 %v211_v56  ;;  %570 = vmatpush.msra.mxu3 %v228_v57  ;;  %v270_v23 = vld [vmem:[%s1619_s1 + $0x6f8] sm:$0xff]  ;;  %v285_v24 = vld [vmem:[%s1619_s1 + $0x770] sm:$0xff]  ;;  %v252_v26 = vld [vmem:[%s1619_s1 + $0x668] sm:$0xff] }
  0x60   :  { %418 = vmatmul.f32.gmra.mxu0 %v35_v58  ;;  %464 = vmatmul.f32.gmra.mxu2 %v37_v59  ;;  %v302_v25 = vld [vmem:[%s1619_s1 + $0x7f8] sm:$0xff]  ;;  %v269_v27 = vld [vmem:[%s1619_s1 + $0x6f0] sm:$0xff]  ;;  %v284_v28 = vld [vmem:[%s1619_s1 + $0x768] sm:$0xff] }
  0x61   :  { %503 = vmatpush.msra.mxu0 %v178_v60  ;;  %525 = vmatpush.msra.mxu1 %v195_v61  ;;  %v301_v29 = vld [vmem:[%s1619_s1 + $0x7f0] sm:$0xff]  ;;  %v251_v30 = vld [vmem:[%s1619_s1 + $0x660] sm:$0xff]  ;;  %v268_v31 = vld [vmem:[%s1619_s1 + $0x6e8] sm:$0xff] }
  0x62   :  { %549 = vmatpush.msra.mxu2 %v210_v62  ;;  %571 = vmatpush.msra.mxu3 %v227_v63  ;;  %v283_v32 = vld [vmem:[%s1619_s1 + $0x760] sm:$0xff]  ;;  %v300_v33 = vld [vmem:[%s1619_s1 + $0x7e8] sm:$0xff]  ;;  %v41_v34 = vld [vmem:[%s1618_s0 + $0xd0] sm:$0xff] }
  0x63   :  { %441 = vmatmul.f32.gmra.mxu1 %v36_v0  ;;  %487 = vmatmul.f32.gmra.mxu3 %v38_v1  ;;  %v250_v35 = vld [vmem:[%s1619_s1 + $0x658] sm:$0xff]  ;;  %v267_v36 = vld [vmem:[%s1619_s1 + $0x6e0] sm:$0xff]  ;;  %v249_v41 = vld [vmem:[%s1619_s1 + $0x650] sm:$0xff] }
  0x64   :  { %504 = vmatpush.msra.mxu0 %v177_v2  ;;  %526 = vmatpush.msra.mxu1 %v194_v3  ;;  %v282_v37 = vld [vmem:[%s1619_s1 + $0x758] sm:$0xff]  ;;  %v299_v38 = vld [vmem:[%s1619_s1 + $0x7e0] sm:$0xff]  ;;  %v281_v43 = vld [vmem:[%s1619_s1 + $0x750] sm:$0xff] }
  0x65   :  { %550 = vmatpush.msra.mxu2 %v209_v4  ;;  %572 = vmatpush.msra.mxu3 %v226_v5  ;;  %v39_v39 = vld [vmem:[%s1618_s0 + $0xc0] sm:$0xff]  ;;  %v42_v40 = vld [vmem:[%s1618_s0 + $0xd8] sm:$0xff]  ;;  %v40_v45 = vld [vmem:[%s1618_s0 + $0xc8] sm:$0xff] }
  0x66   :  { %505 = vmatpush.msra.mxu0 %v176_v6  ;;  %527 = vmatpush.msra.mxu1 %v193_v7  ;;  %v266_v42 = vld [vmem:[%s1619_s1 + $0x6d8] sm:$0xff]  ;;  %v248_v46 = vld [vmem:[%s1619_s1 + $0x648] sm:$0xff]  ;;  %v265_v47 = vld [vmem:[%s1619_s1 + $0x6d0] sm:$0xff] }
  0x67   :  { %551 = vmatpush.msra.mxu2 %v208_v8  ;;  %573 = vmatpush.msra.mxu3 %v225_v9  ;;  %v298_v44 = vld [vmem:[%s1619_s1 + $0x7d8] sm:$0xff]  ;;  %v280_v48 = vld [vmem:[%s1619_s1 + $0x748] sm:$0xff]  ;;  %v297_v49 = vld [vmem:[%s1619_s1 + $0x7d0] sm:$0xff] }
  0x68   :  { %506 = vmatpush.msra.mxu0 %v175_v10  ;;  %528 = vmatpush.msra.mxu1 %v192_v11  ;;  %v247_v50 = vld [vmem:[%s1619_s1 + $0x640] sm:$0xff]  ;;  %v264_v51 = vld [vmem:[%s1619_s1 + $0x6c8] sm:$0xff]  ;;  %v246_v54 = vld [vmem:[%s1619_s1 + $0x638] sm:$0xff] }
  0x69   :  { %552 = vmatpush.msra.mxu2 %v207_v12  ;;  %574 = vmatpush.msra.mxu3 %v224_v13  ;;  %v279_v52 = vld [vmem:[%s1619_s1 + $0x740] sm:$0xff]  ;;  %v296_v53 = vld [vmem:[%s1619_s1 + $0x7c8] sm:$0xff]  ;;  %v278_v56 = vld [vmem:[%s1619_s1 + $0x738] sm:$0xff] }
  0x6a   :  { %507 = vmatmul.f32.vlgmr.msra.gmra.mxu0 %v23_v14  ;;  %553 = vmatmul.f32.vlgmr.msra.gmra.mxu2 %v25_v15  ;;  %v263_v55 = vld [vmem:[%s1619_s1 + $0x6c0] sm:$0xff]  ;;  %v245_v58 = vld [vmem:[%s1619_s1 + $0x630] sm:$0xff]  ;;  %v262_v59 = vld [vmem:[%s1619_s1 + $0x6b8] sm:$0xff] }
  0x6b   :  { %583 = vmatpush.msrb.mxu0 %v254_v16  ;;  %629 = vmatpush.msrb.mxu2 %v286_v17  ;;  %v295_v57 = vld [vmem:[%s1619_s1 + $0x7c0] sm:$0xff]  ;;  %v277_v60 = vld [vmem:[%s1619_s1 + $0x730] sm:$0xff]  ;;  %v294_v61 = vld [vmem:[%s1619_s1 + $0x7b8] sm:$0xff] }
  0x6c   :  { %529 = vmatpush.msra.mxu1 %v191_v18  ;;  %575 = vmatpush.msra.mxu3 %v223_v19  ;;  %v244_v62 = vld [vmem:[%s1619_s1 + $0x628] sm:$0xff]  ;;  %v261_v63 = vld [vmem:[%s1619_s1 + $0x6b0] sm:$0xff]  ;;  %v243_v2 = vld [vmem:[%s1619_s1 + $0x620] sm:$0xff] }
  0x6d   :  { %530 = vmatmul.f32.vlgmr.msra.gmra.mxu1 %v24_v20  ;;  %576 = vmatmul.f32.vlgmr.msra.gmra.mxu3 %v26_v21  ;;  %v276_v0 = vld [vmem:[%s1619_s1 + $0x728] sm:$0xff]  ;;  %v293_v1 = vld [vmem:[%s1619_s1 + $0x7b0] sm:$0xff]  ;;  %v275_v4 = vld [vmem:[%s1619_s1 + $0x720] sm:$0xff] }
  0x6e   :  { %584 = vmatpush.msrb.mxu0 %v253_v22  ;;  %606 = vmatpush.msrb.mxu1 %v270_v23  ;;  %v260_v3 = vld [vmem:[%s1619_s1 + $0x6a8] sm:$0xff]  ;;  %v242_v6 = vld [vmem:[%s1619_s1 + $0x618] sm:$0xff]  ;;  %v259_v7 = vld [vmem:[%s1619_s1 + $0x6a0] sm:$0xff] }
  0x6f   :  { %630 = vmatpush.msrb.mxu2 %v285_v24  ;;  %652 = vmatpush.msrb.mxu3 %v302_v25  ;;  %v292_v5 = vld [vmem:[%s1619_s1 + $0x7a8] sm:$0xff]  ;;  %v274_v8 = vld [vmem:[%s1619_s1 + $0x718] sm:$0xff]  ;;  %v291_v9 = vld [vmem:[%s1619_s1 + $0x7a0] sm:$0xff] }
  0x70   :  { %585 = vmatpush.msrb.mxu0 %v252_v26  ;;  %607 = vmatpush.msrb.mxu1 %v269_v27  ;;  %v241_v10 = vld [vmem:[%s1619_s1 + $0x610] sm:$0xff]  ;;  %v258_v11 = vld [vmem:[%s1619_s1 + $0x698] sm:$0xff]  ;;  %v240_v14 = vld [vmem:[%s1619_s1 + $0x608] sm:$0xff] }
  0x71   :  { %631 = vmatpush.msrb.mxu2 %v284_v28  ;;  %653 = vmatpush.msrb.mxu3 %v301_v29  ;;  %v273_v12 = vld [vmem:[%s1619_s1 + $0x710] sm:$0xff]  ;;  %v290_v13 = vld [vmem:[%s1619_s1 + $0x798] sm:$0xff]  ;;  %v272_v16 = vld [vmem:[%s1619_s1 + $0x708] sm:$0xff] }
  0x72   :  { %586 = vmatpush.msrb.mxu0 %v251_v30  ;;  %608 = vmatpush.msrb.mxu1 %v268_v31  ;;  %v257_v15 = vld [vmem:[%s1619_s1 + $0x690] sm:$0xff]  ;;  %v239_v18 = vld [vmem:[%s1619_s1 + $0x600] sm:$0xff]  ;;  %v256_v19 = vld [vmem:[%s1619_s1 + $0x688] sm:$0xff] }
  0x73   :  { %632 = vmatpush.msrb.mxu2 %v283_v32  ;;  %654 = vmatpush.msrb.mxu3 %v300_v33  ;;  %v289_v17 = vld [vmem:[%s1619_s1 + $0x790] sm:$0xff]  ;;  %v271_v20 = vld [vmem:[%s1619_s1 + $0x700] sm:$0xff]  ;;  %v288_v21 = vld [vmem:[%s1619_s1 + $0x788] sm:$0xff] }
  0x74   :  { %556 = vmatmul.f32.gmra.mxu2 %v41_v34  ;;  %587 = vmatpush.msrb.mxu0 %v250_v35  ;;  %v27_v22 = vld [vmem:[%s1618_s0 + $0x60] sm:$0xff]  ;;  %v29_v23 = vld [vmem:[%s1618_s0 + $0x70] sm:$0xff]  ;;  %v28_v26 = vld [vmem:[%s1618_s0 + $0x68] sm:$0xff] }
  0x75   :  { %609 = vmatpush.msrb.mxu1 %v267_v36  ;;  %633 = vmatpush.msrb.mxu2 %v282_v37  ;;  %v255_v24 = vld [vmem:[%s1619_s1 + $0x680] sm:$0xff]  ;;  %v30_v27 = vld [vmem:[%s1618_s0 + $0x78] sm:$0xff]  ;;  %v45_v29 = vld [vmem:[%s1618_s0 + $0xf0] sm:$0xff] }
  0x76   :  { %655 = vmatpush.msrb.mxu3 %v299_v38  ;;  %510 = vmatmul.f32.gmra.mxu0 %v39_v39  ;;  %v287_v25 = vld [vmem:[%s1619_s1 + $0x780] sm:$0xff]  ;;  %v44_v30 = vld [vmem:[%s1618_s0 + $0xe8] sm:$0xff]  ;;  %v46_v31 = vld [vmem:[%s1618_s0 + $0xf8] sm:$0xff] }
  0x77   :  { %579 = vmatmul.f32.gmra.mxu3 %v42_v40  ;;  %588 = vmatpush.msrb.mxu0 %v249_v41  ;;  %v43_v28 = vld [vmem:[%s1618_s0 + $0xe0] sm:$0xff]  ;;  %s725_s0 = smov [#allocation2]  }
  0x78   :  { %610 = vmatpush.msrb.mxu1 %v266_v42  ;;  %634 = vmatpush.msrb.mxu2 %v281_v43  ;;  %v698_v37 = vld [vmem:[%s1620_s2] ss:$0 sm:$0xff]  ;;  %s681_s2 = sshll.u32 %s725_s0, 4  ;;  %s682_s2 = int_to_ptr.vmem [resolvable:$true] %s681_s2 }
  0x79   :  { %656 = vmatpush.msrb.mxu3 %v298_v44  ;;  %533 = vmatmul.f32.gmra.mxu1 %v40_v45 }
  0x7a   :  { %589 = vmatpush.msrb.mxu0 %v248_v46  ;;  %611 = vmatpush.msrb.mxu1 %v265_v47 }
  0x7b   :  { %635 = vmatpush.msrb.mxu2 %v280_v48  ;;  %657 = vmatpush.msrb.mxu3 %v297_v49 }
  0x7c   :  { %590 = vmatpush.msrb.mxu0 %v247_v50  ;;  %612 = vmatpush.msrb.mxu1 %v264_v51 }
  0x7d   :  { %636 = vmatpush.msrb.mxu2 %v279_v52  ;;  %658 = vmatpush.msrb.mxu3 %v296_v53 }
  0x7e   :  { %591 = vmatpush.msrb.mxu0 %v246_v54  ;;  %613 = vmatpush.msrb.mxu1 %v263_v55 }
  0x7f   :  { %637 = vmatpush.msrb.mxu2 %v278_v56  ;;  %659 = vmatpush.msrb.mxu3 %v295_v57 }
  0x80   :  { %592 = vmatpush.msrb.mxu0 %v245_v58  ;;  %614 = vmatpush.msrb.mxu1 %v262_v59 }
  0x81   :  { %638 = vmatpush.msrb.mxu2 %v277_v60  ;;  %660 = vmatpush.msrb.mxu3 %v294_v61 }
  0x82   :  { %593 = vmatpush.msrb.mxu0 %v244_v62  ;;  %615 = vmatpush.msrb.mxu1 %v261_v63 }
  0x83   :  { %639 = vmatpush.msrb.mxu2 %v276_v0  ;;  %661 = vmatpush.msrb.mxu3 %v293_v1 }
  0x84   :  { %594 = vmatpush.msrb.mxu0 %v243_v2  ;;  %616 = vmatpush.msrb.mxu1 %v260_v3 }
  0x85   :  { %640 = vmatpush.msrb.mxu2 %v275_v4  ;;  %662 = vmatpush.msrb.mxu3 %v292_v5 }
  0x86   :  { %595 = vmatpush.msrb.mxu0 %v242_v6  ;;  %617 = vmatpush.msrb.mxu1 %v259_v7 }
  0x87   :  { %641 = vmatpush.msrb.mxu2 %v274_v8  ;;  %663 = vmatpush.msrb.mxu3 %v291_v9 }
  0x88   :  { %596 = vmatpush.msrb.mxu0 %v241_v10  ;;  %618 = vmatpush.msrb.mxu1 %v258_v11 }
  0x89   :  { %642 = vmatpush.msrb.mxu2 %v273_v12  ;;  %664 = vmatpush.msrb.mxu3 %v290_v13 }
  0x8a   :  { %597 = vmatpush.msrb.mxu0 %v240_v14  ;;  %619 = vmatpush.msrb.mxu1 %v257_v15 }
  0x8b   :  { %643 = vmatpush.msrb.mxu2 %v272_v16  ;;  %665 = vmatpush.msrb.mxu3 %v289_v17 }
  0x8c   :  { %598 = vmatpush.msrb.mxu0 %v239_v18  ;;  %620 = vmatpush.msrb.mxu1 %v256_v19 }
  0x8d   :  { %644 = vmatpush.msrb.mxu2 %v271_v20  ;;  %666 = vmatpush.msrb.mxu3 %v288_v21 }
  0x8e   :  { %599 = vmatmul.f32.vlgmr.msrb.gmra.mxu0 %v27_v22  ;;  %645 = vmatmul.f32.vlgmr.msrb.gmra.mxu2 %v29_v23 }
  0x8f   :  { %621 = vmatpush.msrb.mxu1 %v255_v24  ;;  %667 = vmatpush.msrb.mxu3 %v287_v25 }
  0x90   :  { %622 = vmatmul.f32.vlgmr.msrb.gmra.mxu1 %v28_v26  ;;  %668 = vmatmul.f32.vlgmr.msrb.gmra.mxu3 %v30_v27 }
  0x96   :  { %602 = vmatmul.f32.gmra.mxu0 %v43_v28  ;;  %648 = vmatmul.f32.gmra.mxu2 %v45_v29 }
  0x98   :  { %625 = vmatmul.f32.gmra.mxu1 %v44_v30  ;;  %671 = vmatmul.f32.gmra.mxu3 %v46_v31 }
  0xb9   :  { %v324_v32 = vpop.f32.mrf.mxu0 }
  0xba   :  { %v325_v39 = vadd.f32 %v698_v37, %v324_v32 }
  0xbc   :  { %v347_v33 = vpop.f32.mrf.mxu1 }
  0xbd   :  { %v370_v34 = vpop.f32.mrf.mxu2  ;;  %v348_v42 = vadd.f32 %v347_v33, %v325_v39 }
  0xbf   :  { %v371_v46 = vadd.f32 %v370_v34, %v348_v42 }
  0xc0   :  { %v393_v35 = vpop.f32.mrf.mxu3 }
  0xc1   :  { %v394_v49 = vadd.f32 %v393_v35, %v371_v46 }
  0xc3   :  { %v327_v36 = vpop.f32.mrf.mxu0 }
  0xc4   :  { %v328_v43 = vadd.f32 %v698_v37, %v327_v36 }
  0xc6   :  { %v350_v38 = vpop.f32.mrf.mxu1 }
  0xc7   :  { %v373_v40 = vpop.f32.mrf.mxu2  ;;  %v351_v47 = vadd.f32 %v350_v38, %v328_v43 }
  0xc9   :  { %v374_v50 = vadd.f32 %v373_v40, %v351_v47 }
  0xca   :  { %v396_v41 = vpop.f32.mrf.mxu3 }
  0xcb   :  { %v397_v54 = vadd.f32 %v396_v41, %v374_v50 }
  0xcd   :  { %v416_v44 = vpop.f32.mrf.mxu0 }
  0xce   :  { %v417_v55 = vadd.f32 %v416_v44, %v394_v49 }
  0xd0   :  { %v439_v45 = vpop.f32.mrf.mxu1 }
  0xd1   :  { %v462_v48 = vpop.f32.mrf.mxu2  ;;  %v440_v57 = vadd.f32 %v439_v45, %v417_v55 }
  0xd3   :  { %v463_v61 = vadd.f32 %v462_v48, %v440_v57 }
  0xd4   :  { %v485_v51 = vpop.f32.mrf.mxu3 }
  0xd5   :  { %v486_v0 = vadd.f32 %v485_v51, %v463_v61 }
  0xdd   :  { %v419_v52 = vpop.f32.mrf.mxu0 }
  0xde   :  { %v420_v58 = vadd.f32 %v419_v52, %v397_v54 }
  0xe0   :  { %v442_v53 = vpop.f32.mrf.mxu1 }
  0xe1   :  { %v443_v62 = vadd.f32 %v442_v53, %v420_v58 }
  0xe3   :  { %v465_v56 = vpop.f32.mrf.mxu2 }
  0xe4   :  { %v466_v1 = vadd.f32 %v465_v56, %v443_v62 }
  0xe6   :  { %v488_v59 = vpop.f32.mrf.mxu3 }
  0xe7   :  { %v508_v60 = vpop.f32.mrf.mxu0  ;;  %v489_v5 = vadd.f32 %v488_v59, %v466_v1 }
  0xe8   :  { %v509_v3 = vadd.f32 %v508_v60, %v486_v0 }
  0xea   :  { %v531_v63 = vpop.f32.mrf.mxu1 }
  0xeb   :  { %v532_v7 = vadd.f32 %v531_v63, %v509_v3 }
  0xed   :  { %v554_v2 = vpop.f32.mrf.mxu2 }
  0xee   :  { %v555_v9 = vadd.f32 %v554_v2, %v532_v7 }
  0xf0   :  { %v577_v4 = vpop.f32.mrf.mxu3 }
  0xf1   :  { %v578_v12 = vadd.f32 %v577_v4, %v555_v9 }
  0xf3   :  { %v511_v6 = vpop.f32.mrf.mxu0 }
  0xf4   :  { %v512_v10 = vadd.f32 %v511_v6, %v489_v5 }
  0xf6   :  { %v534_v8 = vpop.f32.mrf.mxu1 }
  0xf7   :  { %v557_v11 = vpop.f32.mrf.mxu2  ;;  %v535_v13 = vadd.f32 %v534_v8, %v512_v10 }
  0xf9   :  { %v558_v18 = vadd.f32 %v557_v11, %v535_v13 }
  0xfa   :  { %v580_v14 = vpop.f32.mrf.mxu3 }
  0xfb   :  { %v581_v21 = vadd.f32 %v580_v14, %v558_v18 }
 0x10b   :  { %v600_v15 = vpop.f32.mrf.mxu0 }
 0x10c   :  { %v601_v16 = vadd.f32 %v600_v15, %v578_v12 }
 0x10d   :  { %v623_v17 = vpop.f32.mrf.mxu1 }
 0x10e   :  { %v624_v19 = vadd.f32 %v623_v17, %v601_v16 }
 0x111   :  { %v646_v20 = vpop.f32.mrf.mxu2 }
 0x112   :  { %v647_v22 = vadd.f32 %v646_v20, %v624_v19 }
 0x113   :  { %v603_v23 = vpop.f32.mrf.mxu0  ;;  %v669_v24 = vpop.f32.mrf.mxu3 }
 0x114   :  { %v604_v25 = vadd.f32 %v603_v23, %v581_v21  ;;  %v670_v26 = vadd.f32 %v669_v24, %v647_v22 }
 0x115   :  { %v626_v27 = vpop.f32.mrf.mxu1 }
 0x116   :  { %675 = vst [vmem:[#allocation2] sm:$0xff] %v670_v26  ;;  %v627_v28 = vadd.f32 %v626_v27, %v604_v25 }
 0x119   :  { %v649_v29 = vpop.f32.mrf.mxu2 }
 0x11a   :  { %v650_v30 = vadd.f32 %v649_v29, %v627_v28 }
 0x11b   :  { %v672_v31 = vpop.f32.mrf.mxu3 }
 0x11c   :  { %v673_v32 = vadd.f32 %v672_v31, %v650_v30 }
 0x11e   :  { %676 = vst [vmem:[#allocation2 + $0x8] sm:$0xff] %v673_v32 }
 0x11f   :  { %689 = dma.vmem_to_hbm [thread:$0]  %s682_s2, 256, %s684_s24, [#allocation3], %s726_s25, %s726_s25, %s727_s26  }
 0x120   :  { %723 = dma.done.wait [#allocation3], 256  }
 0x121   :  { %724 = vsyncadd [#allocation3], 4294967040 }
 0x122   :  { %694 = vsyncpa [#allocation3], 1 }

</bundles_post_ra>
